<compile_context>
chip_gen: v7x
topology: tpu7x:2x2x1
jax: 0.10.0
libtpu: 0.0.40
codegen_flags: <defaults>
</compile_context>

<pallas_src>
import jax
import jax.numpy as jnp
from jax.experimental import pallas as pl
from jax.experimental.pallas import tpu as pltpu


def mema_kernel(q_ref, keys_ref, values_ref, out_ref):
    # q_ref:      (1, K)  query row for this grid step (f32)
    # keys_ref:   (S, K)  memory keys   (bf16 or f32, resident across steps)
    # values_ref: (S, O)  memory values (bf16 or f32, resident across steps)
    # out_ref:    (1, O)  output row for this grid step (f32)
    q = q_ref[...].astype(jnp.float32)            # (1, K)
    keys = keys_ref[...].astype(jnp.float32)      # (S, K)
    values = values_ref[...].astype(jnp.float32)  # (S, O)

    # Scores: keys @ key as a VPU multiply (lane-dense over K) + lane reduce.
    scores = jnp.sum(keys * q, axis=-1, keepdims=True)       # (S, 1)

    # Numerically-stable softmax over the S memory slots (single vreg).
    m = jnp.max(scores, axis=0, keepdims=True)
    p = jnp.exp(scores - m)
    denom = jnp.sum(p, axis=0, keepdims=True)
    attn = p * pl.reciprocal(denom, approx=False)             # (S, 1)

    # Weighted sum of values: VPU multiply + sublane reduce, no transpose.
    out = jnp.sum(values * attn, axis=0, keepdims=True)       # (1, O)
    out_ref[...] = out.astype(out_ref.dtype)


def mema_forward_batched(qs, keys, values):
    """qs: (B, K) queries; keys: (S, K); values: (S, O) -> (B, O) f32."""
    B, K = qs.shape
    S, K2 = keys.shape
    S2, O = values.shape
    assert K == K2 and S == S2

    # Lead with a squeezed batch axis so the block's last-two dims equal the
    # full array dims (satisfies the (8, 128) / full-dim tiling rule).
    qs3 = qs.reshape(B, 1, K)

    out = pl.pallas_call(
        mema_kernel,
        out_shape=jax.ShapeDtypeStruct((B, 1, O), jnp.float32),
        grid=(B,),
        in_specs=[
            pl.BlockSpec((None, 1, K), lambda b: (b, 0, 0)),  # per-step query row
            pl.BlockSpec((S, K), lambda b: (0, 0)),           # keys: VMEM-resident
            pl.BlockSpec((S, O), lambda b: (0, 0)),           # values: VMEM-resident
        ],
        out_specs=pl.BlockSpec((None, 1, O), lambda b: (b, 0, 0)),
        compiler_params=pltpu.CompilerParams(
            dimension_semantics=("parallel",)),
    )(qs3, keys, values)
    return out.reshape(B, O)


def mema_forward(x, keys, values):
    """Single-query forward, identical to torch MemA.forward(x): returns (O,)."""
    S, K = keys.shape
    q = x.reshape(1, -1)
    assert q.shape[1] == K, "flattened x must have length keysize"
    return mema_forward_batched(q, keys, values).reshape(values.shape[1])


if __name__ == "__main__":
    # Small, deterministic setup consistent with MemA(size, keysize, outputsize).
    size = 8                        # number of memory slots S
    x_shape = (2, 4, 16, 16)        # NCHW-style input; flattened -> keysize
    keysize = 2 * 4 * 16 * 16       # = 2048
    outputsize = 32

    root = jax.random.PRNGKey(0)
    k_keys, k_values, k_x, k_xb = jax.random.split(root, 4)

    # Parameters stored in bf16 (halves keys HBM traffic); compute is f32.
    keys = jax.random.normal(k_keys, (size, keysize), dtype=jnp.float32
                             ).astype(jnp.bfloat16)
    values = jax.random.normal(k_values, (size, outputsize), dtype=jnp.float32
                               ).astype(jnp.bfloat16)
    x = jax.random.normal(k_x, x_shape, dtype=jnp.float32)

    # --- single-query forward (matches the torch module) ---
    out = jax.block_until_ready(mema_forward(x, keys, values))

    keys_f32 = keys.astype(jnp.float32)
    values_f32 = values.astype(jnp.float32)
    key_vec = x.reshape(-1)
    attn_ref = jax.nn.softmax(keys_f32 @ key_vec, axis=0)
    out_ref = jnp.sum(values_f32 * attn_ref[:, None], axis=0)
    assert out.shape == (outputsize,)
    assert jnp.allclose(out, out_ref, atol=1e-3, rtol=1e-3)

    # --- batched forward: B queries in one pallas_call ---
    B = 4
    xs = jax.random.normal(k_xb, (B, keysize), dtype=jnp.float32)
    outs = jax.block_until_ready(mema_forward_batched(xs, keys, values))
    attn_b = jax.nn.softmax(xs @ keys_f32.T, axis=-1)      # (B, S)
    outs_ref = attn_b @ values_f32                         # (B, O)
    assert outs.shape == (B, outputsize)
    assert jnp.allclose(outs, outs_ref, atol=1e-3, rtol=1e-3)

    print("KERNEL_OK")
</pallas_src>

<mosaic_0001>
module attributes {stable_mosaic.version = 11 : i64} {
  func.func @mema_kernel(%arg0: i32, %arg1: memref<1x1x2048xf32, #tpu.memory_space<vmem>>, %arg2: memref<8x2048xbf16, #tpu.memory_space<vmem>>, %arg3: memref<8x32xbf16, #tpu.memory_space<vmem>>, %arg4: memref<1x1x32xf32, #tpu.memory_space<vmem>>) attributes {dimension_semantics = [#tpu.dimension_semantics<parallel>], iteration_bounds = array<i64: 1>, scalar_prefetch = 0 : i64, scratch_operands = 0 : i64, tpu.core_type = #tpu.core_type<tc>, window_params = [{transform_indices = @transform_0, window_bounds = array<i64: 1, 1, 2048>}, {pipeline_mode = #tpu.pipeline_mode<synchronous>, transform_indices = @transform_1, window_bounds = array<i64: 8, 2048>}, {pipeline_mode = #tpu.pipeline_mode<synchronous>, transform_indices = @transform_2, window_bounds = array<i64: 8, 32>}, {transform_indices = @transform_3, window_bounds = array<i64: 1, 1, 32>}]} {
    %c0 = arith.constant 0 : index
    %c0_0 = arith.constant 0 : index
    %c0_1 = arith.constant 0 : index
    %0 = vector.load %arg1[%c0, %c0_0, %c0_1] : memref<1x1x2048xf32, #tpu.memory_space<vmem>>, vector<1x1x2048xf32>
    %1 = vector.shape_cast %0 : vector<1x1x2048xf32> to vector<1x2048xf32>
    %c0_2 = arith.constant 0 : index
    %c0_3 = arith.constant 0 : index
    %2 = vector.load %arg2[%c0_2, %c0_3] : memref<8x2048xbf16, #tpu.memory_space<vmem>>, vector<8x2048xbf16>
    %3 = arith.extf %2 : vector<8x2048xbf16> to vector<8x2048xf32>
    %c0_4 = arith.constant 0 : index
    %c0_5 = arith.constant 0 : index
    %4 = vector.load %arg3[%c0_4, %c0_5] : memref<8x32xbf16, #tpu.memory_space<vmem>>, vector<8x32xbf16>
    %5 = arith.extf %4 : vector<8x32xbf16> to vector<8x32xf32>
    %6 = vector.broadcast %1 : vector<1x2048xf32> to vector<8x2048xf32>
    %7 = arith.mulf %3, %6 : vector<8x2048xf32>
    %cst = arith.constant dense<0.000000e+00> : vector<8xf32>
    %8 = vector.multi_reduction <add>, %7, %cst [1] : vector<8x2048xf32> to vector<8xf32>
    %9 = vector.shape_cast %8 : vector<8xf32> to vector<8x1xf32>
    %cst_6 = arith.constant dense<0xFF800000> : vector<1xf32>
    %10 = vector.multi_reduction <maximumf>, %9, %cst_6 [0] : vector<8x1xf32> to vector<1xf32>
    %11 = vector.shape_cast %10 : vector<1xf32> to vector<1x1xf32>
    %12 = vector.broadcast %11 : vector<1x1xf32> to vector<8x1xf32>
    %13 = arith.subf %9, %12 : vector<8x1xf32>
    %14 = math.exp %13 : vector<8x1xf32>
    %cst_7 = arith.constant dense<0.000000e+00> : vector<1xf32>
    %15 = vector.multi_reduction <add>, %14, %cst_7 [0] : vector<8x1xf32> to vector<1xf32>
    %16 = vector.shape_cast %15 : vector<1xf32> to vector<1x1xf32>
    %17 = tpu.reciprocal %16 : vector<1x1xf32> -> vector<1x1xf32>
    %18 = vector.broadcast %17 : vector<1x1xf32> to vector<8x1xf32>
    %19 = arith.mulf %14, %18 : vector<8x1xf32>
    %20 = vector.broadcast %19 : vector<8x1xf32> to vector<8x32xf32>
    %21 = arith.mulf %5, %20 : vector<8x32xf32>
    %cst_8 = arith.constant dense<0.000000e+00> : vector<32xf32>
    %22 = vector.multi_reduction <add>, %21, %cst_8 [0] : vector<8x32xf32> to vector<32xf32>
    %23 = vector.shape_cast %22 : vector<32xf32> to vector<1x32xf32>
    %c0_9 = arith.constant 0 : index
    %c0_10 = arith.constant 0 : index
    %c0_11 = arith.constant 0 : index
    %24 = vector.load %arg4[%c0_9, %c0_10, %c0_11] : memref<1x1x32xf32, #tpu.memory_space<vmem>>, vector<1x1x32xf32>
    %25 = vector.shape_cast %24 : vector<1x1x32xf32> to vector<1x32xf32>
    %26 = vector.shape_cast %23 : vector<1x32xf32> to vector<1x1x32xf32>
    tpu.vector_store %arg4[%c0_9, %c0_10, %c0_11], %26 {strides = array<i32>} : memref<1x1x32xf32, #tpu.memory_space<vmem>>, vector<1x1x32xf32>,
    return
  }
  func.func @transform_0(%arg0: i32) -> (i32, i32, i32) {
    %c0_i32 = arith.constant 0 : i32
    %c0_i32_0 = arith.constant 0 : i32
    %c0_i32_1 = arith.constant 0 : i32
    return %arg0, %c0_i32, %c0_i32_0 : i32, i32, i32
  }
  func.func @transform_1(%arg0: i32) -> (i32, i32) {
    %c0_i32 = arith.constant 0 : i32
    %c0_i32_0 = arith.constant 0 : i32
    %c0_i32_1 = arith.constant 0 : i32
    return %c0_i32, %c0_i32_0 : i32, i32
  }
  func.func @transform_2(%arg0: i32) -> (i32, i32) {
    %c0_i32 = arith.constant 0 : i32
    %c0_i32_0 = arith.constant 0 : i32
    %c0_i32_1 = arith.constant 0 : i32
    return %c0_i32, %c0_i32_0 : i32, i32
  }
  func.func @transform_3(%arg0: i32) -> (i32, i32, i32) {
    %c0_i32 = arith.constant 0 : i32
    %c0_i32_0 = arith.constant 0 : i32
    %c0_i32_1 = arith.constant 0 : i32
    return %arg0, %c0_i32, %c0_i32_0 : i32, i32, i32
  }
}

</mosaic_0001>

<bundles_post_ra>
// kernel: tpu_custom_call.1
= control target key start
LH: loop header
LB: loop body
LE: loop exit
PB: predicated region body
PF: predicated region fallthrough
CT: control target
= control target key end

     0   :  { %8 = vsyncpa [#allocation3], 0  ;;  %s377_s0 = inlined_call_operand.hbm [shape: f32[1,1,2048], index: 0, kind: input, shape index: {}]   ;;  %s378_s1 = inlined_call_operand.hbm [shape: bf16[8,2048], index: 1, kind: input, shape index: {}]   ;;  %s379_s2 = inlined_call_operand.vmem [shape: bf16[8,32], index: 2, kind: input, shape index: {}]   ;;  %s380_s3 = inlined_call_operand.hbm [shape: f32[1,1,32], index: 3, kind: output, shape index: {}]  }
   0x1   :  { %9 = vsyncpa [#allocation6], 0 }
   0x2   :  { %10 = vsyncpa [#allocation4], 0  ;;  %s305_s12 = smov [#allocation2]   ;;  %s306_s14 = smov [#allocation5]  }
   0x3   :  { %s17_s13 = sshll.u32 %s305_s12, 4  ;;  %s27_s15 = sshll.u32 %s306_s14, 4  ;;  %s18_s13 = int_to_ptr.vmem [resolvable:$true] %s17_s13  ;;  %s28_s15 = int_to_ptr.vmem [resolvable:$true] %s27_s15 }
   0x4   :  { %s233_s18 = scalar_lea.hbm %s377_s0, 256 }
   0x5   :  { %p234_p0 = scmp.ne.s32.totalorder %s377_s0, %s233_s18  ;;  %p237_p1 = scmp.lt.u32.totalorder %s233_s18, %s377_s0 }
   0x7   :  { %p239_p2 = pnand %p237_p1, %p234_p0 }
   0x9   :  { %242 = shalt.err (!%p239_p2)
}
   0xa   :  { %s243_s23 = scalar_lea.vmem %s18_s13, 256  ;;  %p248_p4 = scmp.lt.s32.totalorder %s18_s13, %s18_s13 }
   0xb   :  { %p244_p3 = scmp.ne.s32.totalorder %s18_s13, %s243_s23  ;;  %p249_p5 = scmp.lt.s32.totalorder %s243_s23, %s243_s23 }
   0xd   :  { %p250_p6 = por %p249_p5, %p248_p4 }
   0xf   :  { %p251_p7 = pnand %p250_p6, %p244_p3 }
  0x11   :  { %254 = shalt.err (!%p251_p7)
}
  0x12   :  { %20 = dma.hbm_to_vmem [thread:$0]  %s377_s0, 256, %s18_s13, [#allocation3]  }
  0x13   :  { %s255_s28 = scalar_lea.hbm %s378_s1, 1024 }
  0x14   :  { %p256_p8 = scmp.ne.s32.totalorder %s378_s1, %s255_s28  ;;  %p259_p9 = scmp.lt.u32.totalorder %s255_s28, %s378_s1 }
  0x16   :  { %p261_p10 = pnand %p259_p9, %p256_p8 }
  0x18   :  { %264 = shalt.err (!%p261_p10)
}
  0x19   :  { %s265_s6 = scalar_lea.vmem %s28_s15, 1024  ;;  %p270_p12 = scmp.lt.s32.totalorder %s28_s15, %s28_s15 }
  0x1a   :  { %p266_p11 = scmp.ne.s32.totalorder %s28_s15, %s265_s6  ;;  %p271_p13 = scmp.lt.s32.totalorder %s265_s6, %s265_s6 }
  0x1c   :  { %p272_p0 = por %p271_p13, %p270_p12 }
  0x1e   :  { %p273_p1 = pnand %p272_p0, %p266_p11 }
  0x20   :  { %276 = shalt.err (!%p273_p1)
}
  0x21   :  { %30 = dma.hbm_to_vmem [thread:$0]  %s378_s1, 1024, %s28_s15, [#allocation6]  }
  0x22   :  { %299 = dma.done.wait [#allocation3], 256  }
  0x23   :  { %300 = vsyncadd [#allocation3], 4294967040 }
  0x24   :  { %301 = dma.done.wait [#allocation6], 1024  }
  0x25   :  { %302 = vsyncadd [#allocation6], 4294966272  ;;  %v69_v0 = vlaneseq  ;;  %v39_v4 = vld [vmem:[#allocation2] sm:$0xff]  ;;  %v41_v5 = vld [vmem:[#allocation5] sm:$0xff]  ;;  %vm200_vm0 = vcmask 261120   ;;  %s307_s9 = smov [#allocation7]  }
  0x26   :  { %v42_v7 = vld [vmem:[#allocation5 + $0x8] sm:$0xff]  ;;  %v49_v9 = vunpack.c.l.bf16 %v41_v5  ;;  %v50_v10 = vunpack.c.h.bf16 %v41_v5  ;;  %v43_v16 = vld [vmem:[#allocation5 + $0x10] sm:$0xff]  ;;  %v44_v26 = vld [vmem:[#allocation5 + $0x18] sm:$0xff]  ;;  %s216_s10 = sshll.u32 %s307_s9, 4  ;;  %vm208_vm1 = vcmask 253952   ;;  %s217_s10 = int_to_ptr.vmem [resolvable:$true] %s216_s10 }
  0x27   :  { %v352_v1 = vshrl.u32 %v69_v0, 7  ;;  %v51_v13 = vunpack.c.l.bf16 %v42_v7  ;;  %v52_v18 = vunpack.c.h.bf16 %v42_v7  ;;  %v53_v22 = vunpack.c.l.bf16 %v43_v16  ;;  %v40_v36 = vld [vmem:[#allocation2 + $0x8] sm:$0xff]  ;;  %v45_v37 = vld [vmem:[#allocation5 + $0x20] sm:$0xff]  ;;  %v46_v46 = vld [vmem:[#allocation5 + $0x28] sm:$0xff]  ;;  %s277_s11 = scalar_lea.vmem %s217_s10, 16  ;;  %p282_p3 = scmp.lt.s32.totalorder %s217_s10, %s217_s10 }
  0x28   :  { %v54_v28 = vunpack.c.h.bf16 %v43_v16  ;;  %v55_v32 = vunpack.c.l.bf16 %v44_v26  ;;  %v56_v38 = vunpack.c.h.bf16 %v44_v26  ;;  %v57_v42 = vunpack.c.l.bf16 %v45_v37  ;;  %v47_v55 = vld [vmem:[#allocation5 + $0x30] sm:$0xff]  ;;  %v48_v0 = vld [vmem:[#allocation5 + $0x38] sm:$0xff]  ;;  %p278_p2 = scmp.ne.s32.totalorder %s217_s10, %s277_s11 }
  0x29   :  { %v71_v2 = vsub.s32 0, %v352_v1  ;;  %v75_v3 = vsub.s32 1, %v352_v1  ;;  %v79_v6 = vsub.s32 2, %v352_v1  ;;  %v83_v8 = vsub.s32 3, %v352_v1 }
  0x2a   :  { %v87_v15 = vsub.s32 4, %v352_v1  ;;  %v91_v17 = vsub.s32 5, %v352_v1  ;;  %v95_v24 = vsub.s32 6, %v352_v1  ;;  %v99_v27 = vsub.s32 7, %v352_v1 }
  0x2b   :  { %v72_v11 = vrot.slane %v39_v4, %v71_v2  ;;  %v76_v12 = vrot.slane %v39_v4, %v75_v3  ;;  %v80_v14 = vrot.slane %v39_v4, %v79_v6  ;;  %v84_v19 = vrot.slane %v39_v4, %v83_v8 }
  0x2c   :  { %v88_v23 = vrot.slane %v39_v4, %v87_v15  ;;  %v92_v29 = vrot.slane %v39_v4, %v91_v17  ;;  %v96_v33 = vrot.slane %v39_v4, %v95_v24  ;;  %v100_v39 = vrot.slane %v39_v4, %v99_v27 }
  0x2d   :  { %v149_v20 = vmul.f32 %v72_v11, %v49_v9  ;;  %v150_v21 = vmul.f32 %v76_v12, %v50_v10  ;;  %v151_v25 = vmul.f32 %v80_v14, %v51_v13  ;;  %v152_v30 = vmul.f32 %v84_v19, %v52_v18 }
  0x2e   :  { %v153_v34 = vmul.f32 %v88_v23, %v53_v22  ;;  %v154_v40 = vmul.f32 %v92_v29, %v54_v28  ;;  %v104_v43 = vrot.slane %v40_v36, %v71_v2  ;;  %v155_v44 = vmul.f32 %v96_v33, %v55_v32 }
  0x2f   :  { %v165_v31 = vadd.f32 %v150_v21, %v149_v20  ;;  %v58_v47 = vunpack.c.h.bf16 %v45_v37  ;;  %v108_v48 = vrot.slane %v40_v36, %v75_v3  ;;  %v156_v49 = vmul.f32 %v100_v39, %v56_v38 }
  0x30   :  { %v59_v51 = vunpack.c.l.bf16 %v46_v46  ;;  %v112_v52 = vrot.slane %v40_v36, %v79_v6  ;;  %v157_v53 = vmul.f32 %v104_v43, %v57_v42  ;;  %v60_v56 = vunpack.c.h.bf16 %v46_v46 }
  0x31   :  { %v166_v35 = vadd.f32 %v165_v31, %v151_v25  ;;  %v116_v57 = vrot.slane %v40_v36, %v83_v8  ;;  %v158_v58 = vmul.f32 %v108_v48, %v58_v47  ;;  %v61_v60 = vunpack.c.l.bf16 %v47_v55 }
  0x32   :  { %v120_v61 = vrot.slane %v40_v36, %v87_v15  ;;  %v159_v62 = vmul.f32 %v112_v52, %v59_v51  ;;  %v62_v1 = vunpack.c.h.bf16 %v47_v55  ;;  %v124_v2 = vrot.slane %v40_v36, %v91_v17 }
  0x33   :  { %v167_v41 = vadd.f32 %v166_v35, %v152_v30  ;;  %v160_v4 = vmul.f32 %v116_v57, %v60_v56  ;;  %v63_v5 = vunpack.c.l.bf16 %v48_v0  ;;  %v128_v7 = vrot.slane %v40_v36, %v95_v24  ;;  %v65_v35 = vld [vmem:[%s379_s2] sm:$0xf]  ;;  %s281_s2 = scalar_lea.vmem %s217_s10, 32 }
  0x34   :  { %v161_v9 = vmul.f32 %v120_v61, %v61_v60  ;;  %v64_v10 = vunpack.c.h.bf16 %v48_v0  ;;  %v132_v11 = vrot.slane %v40_v36, %v99_v27  ;;  %v162_v12 = vmul.f32 %v124_v2, %v62_v1  ;;  %p283_p4 = scmp.lt.s32.totalorder %s281_s2, %s277_s11 }
  0x35   :  { %v168_v45 = vadd.f32 %v167_v41, %v153_v34  ;;  %v163_v8 = vmul.f32 %v128_v7, %v63_v5  ;;  %v66_v36 = vunpack.c.l.bf16 %v65_v35 }
  0x36   :  { %v164_v16 = vmul.f32 %v132_v11, %v64_v10  ;;  %p284_p5 = por %p283_p4, %p282_p3 }
  0x37   :  { %v169_v50 = vadd.f32 %v168_v45, %v154_v40 }
  0x38   :  { %p285_p6 = pnand %p284_p5, %p278_p2 }
  0x39   :  { %v170_v54 = vadd.f32 %v169_v50, %v155_v44 }
  0x3b   :  { %v171_v59 = vadd.f32 %v170_v54, %v156_v49 }
  0x3d   :  { %v172_v63 = vadd.f32 %v171_v59, %v157_v53 }
  0x3f   :  { %v173_v3 = vadd.f32 %v172_v63, %v158_v58 }
  0x41   :  { %v174_v6 = vadd.f32 %v173_v3, %v159_v62 }
  0x43   :  { %v175_v13 = vadd.f32 %v174_v6, %v160_v4 }
  0x45   :  { %v176_v14 = vadd.f32 %v175_v13, %v161_v9 }
  0x47   :  { %v177_v18 = vadd.f32 %v176_v14, %v162_v12 }
  0x49   :  { %v178_v15 = vadd.f32 %v177_v18, %v163_v8 }
  0x4b   :  { %v179_v19 = vadd.f32 %v178_v15, %v164_v16 }
  0x4d   :  { %180 = vadd.xlane.f32.xlu0 %v179_v19 }
  0xda   :  { %v181_v20 = vpop.xlane.xlu0 %180 }
  0xdb   :  { %v182_v21 = vrot.slane %v181_v20, 4 }
  0xdd   :  { %v183_v17 = vmax.f32 %v181_v20, %v182_v21 }
  0xdf   :  { %v184_v22 = vrot.slane %v183_v17, 2 }
  0xe1   :  { %v185_v23 = vmax.f32 %v183_v17, %v184_v22 }
  0xe3   :  { %v186_v25 = vrot.slane %v185_v23, 1 }
  0xe5   :  { %v187_v24 = vmax.f32 %v185_v23, %v186_v25 }
  0xe7   :  { %v188_v26 = vsub.f32 %v181_v20, %v187_v24 }
  0xe9   :  { %v189_v28 = vmul.f32 1.442695, %v188_v26 }
  0xeb   :  { %229 = vpow2.f32 %v189_v28 }
  0xf5   :  { %v230_v27 = vpop.eup %229 }
  0xf6   :  { %v191_v29 = vrot.slane %v230_v27, 4 }
  0xf8   :  { %v192_v30 = vadd.f32 %v230_v27, %v191_v29 }
  0xfa   :  { %v193_v31 = vrot.slane %v192_v30, 2 }
  0xfc   :  { %v194_v32 = vadd.f32 %v193_v31, %v192_v30 }
  0xfe   :  { %v195_v33 = vrot.slane %v194_v32, 1 }
 0x100   :  { %v196_v34 = vadd.f32 %v195_v33, %v194_v32 }
 0x102   :  { %231 = vrcp.f32 %v196_v34 }
 0x10c   :  { %v232_v37 = vpop.eup %231 }
 0x10d   :  { %v198_v38 = vmul.f32 %v232_v37, %v230_v27 }
 0x10f   :  { %v199_v39 = vmul.f32 %v198_v38, %v66_v36 }
 0x111   :  { %v201_v40 = vsel %vm200_vm0, %v199_v39, 0.0 }
 0x112   :  { %v202_v41 = vrot.slane %v201_v40, 4 }
 0x114   :  { %v203_v42 = vadd.f32 %v202_v41, %v201_v40 }
 0x116   :  { %v204_v43 = vrot.slane %v203_v42, 2 }
 0x118   :  { %v205_v44 = vadd.f32 %v204_v43, %v203_v42 }
 0x11a   :  { %v206_v45 = vrot.slane %v205_v44, 1 }
 0x11c   :  { %v207_v46 = vadd.f32 %v206_v45, %v205_v44 }
 0x11e   :  { %209 = vst.msk [vmem:[#allocation7] sm:$0x1] %vm208_vm1, %v207_v46 }
 0x11f   :  { %288 = shalt.err (!%p285_p6)
}
 0x120   :  { %s289_s14 = scalar_lea.hbm %s380_s3, 16 }
 0x121   :  { %p290_p7 = scmp.ne.s32.totalorder %s380_s3, %s289_s14  ;;  %p293_p8 = scmp.lt.u32.totalorder %s289_s14, %s380_s3 }
 0x123   :  { %p295_p9 = pnand %p293_p8, %p290_p7 }
 0x125   :  { %298 = shalt.err (!%p295_p9)
}
 0x126   :  { %219 = dma.vmem_to_hbm [thread:$0]  %s217_s10, 16, %s380_s3, [#allocation4]  }
 0x127   :  { %303 = dma.done.wait [#allocation4], 16  }
 0x128   :  { %304 = vsyncadd [#allocation4], 4294967280 }
 0x129   :  { %223 = vsyncpa [#allocation3], 1 }
 0x12a   :  { %224 = vsyncpa [#allocation6], 1 }
 0x12b   :  { %225 = vsyncpa [#allocation4], 1 }

</bundles_post_ra>
